<compile_context>
chip_gen: v5e
topology: v5e:2x2
jax: 0.10.0
libtpu: 0.0.40
codegen_flags: <defaults>
</compile_context>

<pallas_src>
import jax
import jax.numpy as jnp
from jax import lax
from jax.experimental import pallas as pl
from jax.experimental.pallas import tpu as pltpu

LEAKY_SLOPE = 0.01  # nn.LeakyReLU() default negative_slope


def _leaky(v):
    return jnp.where(v >= 0, v, LEAKY_SLOPE * v)


def bead_kernel(xpad_ref, w3b_ref, wrb_ref, b3_ref, b1_ref, out_ref):
    """One batch-block per grid step.

    xpad_ref : (nb, H+2, (W+2)*Cin)   reflection-padded input, row slabs
    w3b_ref  : (3, (W+2)*Cin, W*Cout) banded 3x3 conv weights (one per dy)
    wrb_ref  : ((W+2)*Cin, W*Cout)    banded 1x1 residual conv weights
    b3_ref   : (1, W*Cout)            3x3 bias, tiled over W
    b1_ref   : (1, W*Cout)            1x1 bias, tiled over W
    out_ref  : (nb, H, W*Cout)        lane-dense output slabs
    """
    nb, Hp, K = xpad_ref.shape
    _, H, N = out_ref.shape

    xp = xpad_ref[...]                                   # (nb, Hp, K)

    # Row-shifted slabs, batch folded into the matmul M dimension.
    r0 = xp[:, 0:H, :].reshape(nb * H, K)
    r1 = xp[:, 1:H + 1, :].reshape(nb * H, K)            # also the 1x1 input
    r2 = xp[:, 2:H + 2, :].reshape(nb * H, K)

    # 3x3 conv as 3 banded matmuls: (nb*H, K) x (K, N) -> (nb*H, N)
    conv = (jnp.dot(r0, w3b_ref[0], preferred_element_type=jnp.float32)
            + jnp.dot(r1, w3b_ref[1], preferred_element_type=jnp.float32)
            + jnp.dot(r2, w3b_ref[2], preferred_element_type=jnp.float32)
            + b3_ref[...])

    # 1x1 residual conv reuses the dy=1 slab (no separate input stream).
    res = jnp.dot(r1, wrb_ref[...], preferred_element_type=jnp.float32) + b1_ref[...]

    conv = _leaky(conv)
    res = _leaky(res)
    out = conv * res + res                               # (nb*H, N) lane-dense

    out_ref[...] = out.reshape(nb, H, N).astype(out_ref.dtype)


def _pick_batch_block(B, max_nb=8):
    nb = min(B, max_nb)
    while B % nb:
        nb -= 1
    return nb


def bead_forward(x_nchw, w3, b3, w1, b1, *, matmul_dtype=jnp.float32,
                 max_batch_block=8):
    """x_nchw: (B, Cin, H, W) float32 (PyTorch layout).  Returns (B, Cout, H, W).

    `matmul_dtype=jnp.bfloat16` halves DMA bytes / VMEM on v6e/v7x (f32 accum
    is kept via preferred_element_type); default is f32 for bitwise-tight
    agreement with the f32 reference.
    """
    B, Cin, H, W = x_nchw.shape
    Cout = w3.shape[3]
    Hp, Wp = H + 2, W + 2
    K = Wp * Cin
    N = W * Cout

    # NCHW -> NHWC, ReflectionPad2d(1), then fold W into the lane axis.
    x = jnp.transpose(x_nchw, (0, 2, 3, 1))
    xpad = jnp.pad(x, ((0, 0), (1, 1), (1, 1), (0, 0)), mode="reflect")
    xpad_rows = xpad.reshape(B, Hp, K).astype(matmul_dtype)

    # Banded weights.  kron(S_dx, w3[dy,dx]) places w3[dy,dx] at
    # rows [(w+dx)*Cin, ...), cols [w*Cout, ...): a single (H, K)x(K, N)
    # matmul over padded rows then computes the whole conv row.
    def shift_mat(dx):
        return jnp.zeros((Wp, W), jnp.float32).at[
            jnp.arange(W) + dx, jnp.arange(W)].set(1.0)

    w3b = jnp.stack([
        sum(jnp.kron(shift_mat(dx), w3[dy, dx]) for dx in range(3))
        for dy in range(3)
    ]).astype(matmul_dtype)                              # (3, K, N)
    wrb = jnp.kron(shift_mat(1), w1.reshape(Cin, Cout)).astype(matmul_dtype)  # (K, N)

    b3_t = jnp.tile(b3, W).reshape(1, N).astype(jnp.float32)
    b1_t = jnp.tile(b1, W).reshape(1, N).astype(jnp.float32)

    nb = _pick_batch_block(B, max_batch_block)

    out_rows = pl.pallas_call(
        bead_kernel,
        out_shape=jax.ShapeDtypeStruct((B, H, N), jnp.float32),
        grid_spec=pltpu.PrefetchScalarGridSpec(
            num_scalar_prefetch=0,
            grid=(B // nb,),
            in_specs=[
                pl.BlockSpec((nb, Hp, K), lambda b: (b, 0, 0)),
                pl.BlockSpec((3, K, N), lambda b: (0, 0, 0)),
                pl.BlockSpec((K, N), lambda b: (0, 0)),
                pl.BlockSpec((1, N), lambda b: (0, 0)),
                pl.BlockSpec((1, N), lambda b: (0, 0)),
            ],
            out_specs=pl.BlockSpec((nb, H, N), lambda b: (b, 0, 0)),
        ),
        compiler_params=pltpu.CompilerParams(
            dimension_semantics=("parallel",)),
    )(xpad_rows, w3b, wrb, b3_t, b1_t)

    # (B, H, W*Cout) -> (B, H, W, Cout) -> NCHW (cheap un-fold outside kernel)
    return jnp.transpose(out_rows.reshape(B, H, W, Cout), (0, 3, 1, 2))


def bead_reference(x_nchw, w3, b3, w1, b1):
    """Pure-JAX reference (lax.conv) for correctness checking."""
    x = jnp.transpose(x_nchw, (0, 2, 3, 1))
    xpad = jnp.pad(x, ((0, 0), (1, 1), (1, 1), (0, 0)), mode="reflect")
    dn = ("NHWC", "HWIO", "NHWC")
    conv = lax.conv_general_dilated(xpad, w3, (1, 1), "VALID",
                                    dimension_numbers=dn) + b3
    conv = _leaky(conv)
    res = lax.conv_general_dilated(x, w1, (1, 1), "VALID",
                                   dimension_numbers=dn) + b1
    res = _leaky(res)
    out = conv * res + res
    return jnp.transpose(out, (0, 3, 1, 2))


if __name__ == "__main__":
    B, Cin, Cout, H, W = 2, 4, 8, 16, 16

    key = jax.random.PRNGKey(0)
    kx, kw3, kb3, kw1, kb1 = jax.random.split(key, 5)

    x = jax.random.normal(kx, (B, Cin, H, W), dtype=jnp.float32)

    # Deterministic parameter init (Conv2d-style uniform bounds), HWIO layout.
    bound3 = 1.0 / (Cin * 3 * 3) ** 0.5
    w3 = jax.random.uniform(kw3, (3, 3, Cin, Cout), jnp.float32, -bound3, bound3)
    b3 = jax.random.uniform(kb3, (Cout,), jnp.float32, -bound3, bound3)
    bound1 = 1.0 / (Cin * 1 * 1) ** 0.5
    w1 = jax.random.uniform(kw1, (1, 1, Cin, Cout), jnp.float32, -bound1, bound1)
    b1 = jax.random.uniform(kb1, (Cout,), jnp.float32, -bound1, bound1)

    out = bead_forward(x, w3, b3, w1, b1)
    out = jax.block_until_ready(out)

    ref = bead_reference(x, w3, b3, w1, b1)
    assert out.shape == (B, Cout, H, W)
    assert jnp.allclose(out, ref, atol=1e-5, rtol=1e-5), "mismatch vs reference"

    print("KERNEL_OK")
</pallas_src>

<mosaic_0001>
module attributes {stable_mosaic.version = 11 : i64} {
  func.func @bead_kernel(%arg0: i32, %arg1: memref<2x18x72xf32, #tpu.memory_space<vmem>>, %arg2: memref<3x72x128xf32, #tpu.memory_space<vmem>>, %arg3: memref<72x128xf32, #tpu.memory_space<vmem>>, %arg4: memref<1x128xf32, #tpu.memory_space<vmem>>, %arg5: memref<1x128xf32, #tpu.memory_space<vmem>>, %arg6: memref<2x16x128xf32, #tpu.memory_space<vmem>>) attributes {dimension_semantics = [#tpu.dimension_semantics<parallel>], iteration_bounds = array<i64: 1>, scalar_prefetch = 0 : i64, scratch_operands = 0 : i64, tpu.core_type = #tpu.core_type<tc>, window_params = [{transform_indices = @transform_0, window_bounds = array<i64: 2, 18, 72>}, {pipeline_mode = #tpu.pipeline_mode<synchronous>, transform_indices = @transform_1, window_bounds = array<i64: 3, 72, 128>}, {pipeline_mode = #tpu.pipeline_mode<synchronous>, transform_indices = @transform_2, window_bounds = array<i64: 72, 128>}, {pipeline_mode = #tpu.pipeline_mode<synchronous>, transform_indices = @transform_3, window_bounds = array<i64: 1, 128>}, {pipeline_mode = #tpu.pipeline_mode<synchronous>, transform_indices = @transform_4, window_bounds = array<i64: 1, 128>}, {transform_indices = @transform_5, window_bounds = array<i64: 2, 16, 128>}]} {
    %c0 = arith.constant 0 : index
    %c0_0 = arith.constant 0 : index
    %c0_1 = arith.constant 0 : index
    %0 = vector.load %arg1[%c0, %c0_0, %c0_1] : memref<2x18x72xf32, #tpu.memory_space<vmem>>, vector<2x18x72xf32>
    %1 = vector.extract_strided_slice %0 {offsets = [0, 0, 0], sizes = [2, 16, 72], strides = [1, 1, 1]} : vector<2x18x72xf32> to vector<2x16x72xf32>
    %2 = vector.shape_cast %1 : vector<2x16x72xf32> to vector<32x72xf32>
    %3 = vector.extract_strided_slice %0 {offsets = [0, 1, 0], sizes = [2, 16, 72], strides = [1, 1, 1]} : vector<2x18x72xf32> to vector<2x16x72xf32>
    %4 = vector.shape_cast %3 : vector<2x16x72xf32> to vector<32x72xf32>
    %5 = vector.extract_strided_slice %0 {offsets = [0, 2, 0], sizes = [2, 16, 72], strides = [1, 1, 1]} : vector<2x18x72xf32> to vector<2x16x72xf32>
    %6 = vector.shape_cast %5 : vector<2x16x72xf32> to vector<32x72xf32>
    %c0_2 = arith.constant 0 : index
    %c0_3 = arith.constant 0 : index
    %c0_4 = arith.constant 0 : index
    %7 = vector.load %arg2[%c0_2, %c0_3, %c0_4] : memref<3x72x128xf32, #tpu.memory_space<vmem>>, vector<1x72x128xf32>
    %8 = vector.shape_cast %7 : vector<1x72x128xf32> to vector<72x128xf32>
    %cst = arith.constant dense<0.000000e+00> : vector<32x128xf32>
    %9 = tpu.matmul %2, %8, %cst {dimension_numbers = #tpu.dot_dimension_numbers<[1], [0], [0], [1], [0, 0, 1, 1], [], []>} : vector<32x72xf32>, vector<72x128xf32>, vector<32x128xf32> -> vector<32x128xf32>
    %c1 = arith.constant 1 : index
    %c0_5 = arith.constant 0 : index
    %c0_6 = arith.constant 0 : index
    %10 = vector.load %arg2[%c1, %c0_5, %c0_6] : memref<3x72x128xf32, #tpu.memory_space<vmem>>, vector<1x72x128xf32>
    %11 = vector.shape_cast %10 : vector<1x72x128xf32> to vector<72x128xf32>
    %cst_7 = arith.constant dense<0.000000e+00> : vector<32x128xf32>
    %12 = tpu.matmul %4, %11, %cst_7 {dimension_numbers = #tpu.dot_dimension_numbers<[1], [0], [0], [1], [0, 0, 1, 1], [], []>} : vector<32x72xf32>, vector<72x128xf32>, vector<32x128xf32> -> vector<32x128xf32>
    %13 = arith.addf %9, %12 : vector<32x128xf32>
    %c2 = arith.constant 2 : index
    %c0_8 = arith.constant 0 : index
    %c0_9 = arith.constant 0 : index
    %14 = vector.load %arg2[%c2, %c0_8, %c0_9] : memref<3x72x128xf32, #tpu.memory_space<vmem>>, vector<1x72x128xf32>
    %15 = vector.shape_cast %14 : vector<1x72x128xf32> to vector<72x128xf32>
    %cst_10 = arith.constant dense<0.000000e+00> : vector<32x128xf32>
    %16 = tpu.matmul %6, %15, %cst_10 {dimension_numbers = #tpu.dot_dimension_numbers<[1], [0], [0], [1], [0, 0, 1, 1], [], []>} : vector<32x72xf32>, vector<72x128xf32>, vector<32x128xf32> -> vector<32x128xf32>
    %17 = arith.addf %13, %16 : vector<32x128xf32>
    %c0_11 = arith.constant 0 : index
    %c0_12 = arith.constant 0 : index
    %18 = vector.load %arg4[%c0_11, %c0_12] : memref<1x128xf32, #tpu.memory_space<vmem>>, vector<1x128xf32>
    %19 = vector.broadcast %18 : vector<1x128xf32> to vector<32x128xf32>
    %20 = arith.addf %17, %19 : vector<32x128xf32>
    %c0_13 = arith.constant 0 : index
    %c0_14 = arith.constant 0 : index
    %21 = vector.load %arg3[%c0_13, %c0_14] : memref<72x128xf32, #tpu.memory_space<vmem>>, vector<72x128xf32>
    %cst_15 = arith.constant dense<0.000000e+00> : vector<32x128xf32>
    %22 = tpu.matmul %4, %21, %cst_15 {dimension_numbers = #tpu.dot_dimension_numbers<[1], [0], [0], [1], [0, 0, 1, 1], [], []>} : vector<32x72xf32>, vector<72x128xf32>, vector<32x128xf32> -> vector<32x128xf32>
    %c0_16 = arith.constant 0 : index
    %c0_17 = arith.constant 0 : index
    %23 = vector.load %arg5[%c0_16, %c0_17] : memref<1x128xf32, #tpu.memory_space<vmem>>, vector<1x128xf32>
    %24 = vector.broadcast %23 : vector<1x128xf32> to vector<32x128xf32>
    %25 = arith.addf %22, %24 : vector<32x128xf32>
    %cst_18 = arith.constant 0.000000e+00 : f32
    %26 = vector.broadcast %cst_18 : f32 to vector<32x128xf32>
    %27 = arith.cmpf oge, %20, %26 : vector<32x128xf32>
    %cst_19 = arith.constant 0.00999999977 : f32
    %28 = vector.broadcast %cst_19 : f32 to vector<32x128xf32>
    %29 = arith.mulf %28, %20 : vector<32x128xf32>
    %30 = arith.select %27, %20, %29 : vector<32x128xi1>, vector<32x128xf32>
    %cst_20 = arith.constant 0.000000e+00 : f32
    %31 = vector.broadcast %cst_20 : f32 to vector<32x128xf32>
    %32 = arith.cmpf oge, %25, %31 : vector<32x128xf32>
    %cst_21 = arith.constant 0.00999999977 : f32
    %33 = vector.broadcast %cst_21 : f32 to vector<32x128xf32>
    %34 = arith.mulf %33, %25 : vector<32x128xf32>
    %35 = arith.select %32, %25, %34 : vector<32x128xi1>, vector<32x128xf32>
    %36 = arith.mulf %30, %35 : vector<32x128xf32>
    %37 = arith.addf %36, %35 : vector<32x128xf32>
    %38 = vector.shape_cast %37 : vector<32x128xf32> to vector<2x16x128xf32>
    %c0_22 = arith.constant 0 : index
    %c0_23 = arith.constant 0 : index
    %c0_24 = arith.constant 0 : index
    %39 = vector.load %arg6[%c0_22, %c0_23, %c0_24] : memref<2x16x128xf32, #tpu.memory_space<vmem>>, vector<2x16x128xf32>
    tpu.vector_store %arg6[%c0_22, %c0_23, %c0_24], %38 {strides = array<i32>} : memref<2x16x128xf32, #tpu.memory_space<vmem>>, vector<2x16x128xf32>,
    return
  }
  func.func @transform_0(%arg0: i32) -> (i32, i32, i32) {
    %c0_i32 = arith.constant 0 : i32
    %c0_i32_0 = arith.constant 0 : i32
    %c0_i32_1 = arith.constant 0 : i32
    return %arg0, %c0_i32, %c0_i32_0 : i32, i32, i32
  }
  func.func @transform_1(%arg0: i32) -> (i32, i32, i32) {
    %c0_i32 = arith.constant 0 : i32
    %c0_i32_0 = arith.constant 0 : i32
    %c0_i32_1 = arith.constant 0 : i32
    %c0_i32_2 = arith.constant 0 : i32
    return %c0_i32, %c0_i32_0, %c0_i32_1 : i32, i32, i32
  }
  func.func @transform_2(%arg0: i32) -> (i32, i32) {
    %c0_i32 = arith.constant 0 : i32
    %c0_i32_0 = arith.constant 0 : i32
    %c0_i32_1 = arith.constant 0 : i32
    return %c0_i32, %c0_i32_0 : i32, i32
  }
  func.func @transform_3(%arg0: i32) -> (i32, i32) {
    %c0_i32 = arith.constant 0 : i32
    %c0_i32_0 = arith.constant 0 : i32
    %c0_i32_1 = arith.constant 0 : i32
    return %c0_i32, %c0_i32_0 : i32, i32
  }
  func.func @transform_4(%arg0: i32) -> (i32, i32) {
    %c0_i32 = arith.constant 0 : i32
    %c0_i32_0 = arith.constant 0 : i32
    %c0_i32_1 = arith.constant 0 : i32
    return %c0_i32, %c0_i32_0 : i32, i32
  }
  func.func @transform_5(%arg0: i32) -> (i32, i32, i32) {
    %c0_i32 = arith.constant 0 : i32
    %c0_i32_0 = arith.constant 0 : i32
    %c0_i32_1 = arith.constant 0 : i32
    return %arg0, %c0_i32, %c0_i32_0 : i32, i32, i32
  }
}

</mosaic_0001>

<bundles_post_ra>
// kernel: tpu_custom_call.1
= control target key start
LH: loop header
LB: loop body
LE: loop exit
PB: predicated region body
PF: predicated region fallthrough
CT: control target
= control target key end

     0   :  { %10 = vsyncpa [#allocation3], 0  ;;  %s516_s0 = inlined_call_operand.vmem [shape: f32[2,18,72], index: 0, kind: input, shape index: {}]   ;;  %s517_s1 = inlined_call_operand.hbm [shape: f32[3,72,128], index: 1, kind: input, shape index: {}]   ;;  %s518_s2 = inlined_call_operand.vmem [shape: f32[72,128], index: 2, kind: input, shape index: {}]   ;;  %s519_s3 = inlined_call_operand.vmem [shape: f32[1,128], index: 3, kind: input, shape index: {}]   ;;  %s520_s4 = inlined_call_operand.vmem [shape: f32[1,128], index: 4, kind: input, shape index: {}]   ;;  %s521_s5 = inlined_call_operand.hbm [shape: f32[2,16,128], index: 5, kind: output, shape index: {}]  }
   0x1   :  { %11 = vsyncpa [#allocation4], 0  ;;  %s18_s20 = sshll.u32 %s517_s1, 4  ;;  %s395_s21 = smov [#allocation2]   ;;  %s19_s20 = int_to_ptr.hbm [resolvable:$true] %s18_s20 }
   0x2   :  { %s20_s22 = sshll.u32 %s395_s21, 4  ;;  %s396_s23 = smov 128   ;;  %s21_s22 = int_to_ptr.vmem [resolvable:$true] %s20_s22 }
   0x3   :  { %s397_s24 = smov 8  }
   0x4   :  { %26 = dma.hbm_to_vmem [thread:$0]  %s19_s20, 3456, %s21_s22, [#allocation3], %s396_s23, %s396_s23, %s397_s24  }
   0x5   :  { %391 = dma.done.wait [#allocation3], 3456  }
   0x6   :  { %392 = vsyncadd [#allocation3], 4294963840  ;;  %v174_v0 = vld [vmem:[#allocation2 + $0xd0] sm:$0xff]  ;;  %v232_v1 = vld [vmem:[%s518_s2 + $0x40] sm:$0xff]  ;;  %vm60_vm0 = vcmask 1045504   ;;  %vm49_vm1 = vcmask 1046528  }
   0x7   :  { %v173_v2 = vld [vmem:[#allocation2 + $0xc8] sm:$0xff]  ;;  %190 = vmatpush.msra.mxu2 %v174_v0  ;;  %244 = vmatpush.msra.mxu3 %v232_v1  ;;  %v231_v3 = vld [vmem:[%s518_s2 + $0x38] sm:$0xff]  ;;  %v79_v5 = vld [vmem:[#allocation2 + $0x40] sm:$0xff]  ;;  %vm90_vm2 = vcmask 588800   ;;  %s308_s9 = sshll.u32 %s521_s5, 4  ;;  %s309_s9 = int_to_ptr.hbm [resolvable:$true] %s308_s9 }
   0x8   :  { %v89_v4 = vld [vmem:[#allocation2 + $0x88] sm:$0xff]  ;;  %143 = vmatpush.msra.mxu1 %v79_v5  ;;  %v172_v6 = vld [vmem:[#allocation2 + $0xc0] sm:$0xff]  ;;  %v230_v7 = vld [vmem:[%s518_s2 + $0x30] sm:$0xff] }
   0x9   :  { %106 = vmatpush.msra.mxu0 %v89_v4  ;;  %v88_v8 = vld [vmem:[#allocation2 + $0x80] sm:$0xff]  ;;  %191 = vmatpush.msra.mxu2 %v173_v2  ;;  %v78_v9 = vld [vmem:[#allocation2 + $0x38] sm:$0xff]  ;;  %v229_v11 = vld [vmem:[%s518_s2 + $0x28] sm:$0xff] }
   0xa   :  { %245 = vmatpush.msra.mxu3 %v231_v3  ;;  %v171_v10 = vld [vmem:[#allocation2 + $0xb8] sm:$0xff]  ;;  %144 = vmatpush.msra.mxu1 %v78_v9  ;;  %v77_v13 = vld [vmem:[#allocation2 + $0x30] sm:$0xff]  ;;  %v76_v15 = vld [vmem:[#allocation2 + $0x28] sm:$0xff] }
   0xb   :  { %107 = vmatpush.msra.mxu0 %v88_v8  ;;  %v87_v12 = vld [vmem:[#allocation2 + $0x78] sm:$0xff]  ;;  %192 = vmatpush.msra.mxu2 %v172_v6  ;;  %v86_v14 = vld [vmem:[#allocation2 + $0x70] sm:$0xff]  ;;  %v228_v17 = vld [vmem:[%s518_s2 + $0x20] sm:$0xff] }
   0xc   :  { %246 = vmatpush.msra.mxu3 %v230_v7  ;;  %145 = vmatpush.msra.mxu1 %v77_v13  ;;  %v170_v16 = vld [vmem:[#allocation2 + $0xb0] sm:$0xff]  ;;  %v85_v18 = vld [vmem:[#allocation2 + $0x68] sm:$0xff]  ;;  %v75_v19 = vld [vmem:[#allocation2 + $0x20] sm:$0xff] }
   0xd   :  { %108 = vmatpush.msra.mxu0 %v87_v12  ;;  %193 = vmatpush.msra.mxu2 %v171_v10  ;;  %v169_v20 = vld [vmem:[#allocation2 + $0xa8] sm:$0xff]  ;;  %v227_v21 = vld [vmem:[%s518_s2 + $0x18] sm:$0xff]  ;;  %v84_v22 = vld [vmem:[#allocation2 + $0x60] sm:$0xff] }
   0xe   :  { %247 = vmatpush.msra.mxu3 %v229_v11  ;;  %146 = vmatpush.msra.mxu1 %v76_v15  ;;  %v74_v23 = vld [vmem:[#allocation2 + $0x18] sm:$0xff]  ;;  %v168_v24 = vld [vmem:[#allocation2 + $0xa0] sm:$0xff]  ;;  %v226_v25 = vld [vmem:[%s518_s2 + $0x10] sm:$0xff] }
   0xf   :  { %109 = vmatpush.msra.mxu0 %v86_v14  ;;  %194 = vmatpush.msra.mxu2 %v170_v16  ;;  %v37_v26 = vld [vmem:[%s516_s0] sm:$0xff]  ;;  %v83_v27 = vld [vmem:[#allocation2 + $0x58] sm:$0xff]  ;;  %v73_v28 = vld [vmem:[#allocation2 + $0x10] sm:$0xff] }
  0x10   :  { %248 = vmatpush.msra.mxu3 %v228_v17  ;;  %147 = vmatpush.msra.mxu1 %v75_v19  ;;  %v38_v29 = vld [vmem:[%s516_s0 + $0x8] sm:$0xff]  ;;  %v61_v30 = vrot.slane %v37_v26, 2  ;;  %v50_v31 = vrot.slane %v37_v26, 1  ;;  %v167_v32 = vld [vmem:[#allocation2 + $0x98] sm:$0xff]  ;;  %v166_v36 = vld [vmem:[#allocation2 + $0x90] sm:$0xff] }
  0x11   :  { %110 = vmatpush.msra.mxu0 %v85_v18  ;;  %195 = vmatpush.msra.mxu2 %v169_v20  ;;  %v225_v33 = vld [vmem:[%s518_s2 + $0x8] sm:$0xff]  ;;  %v62_v34 = vrot.slane %v38_v29, 2  ;;  %v51_v35 = vrot.slane %v38_v29, 1  ;;  %v82_v37 = vld [vmem:[#allocation2 + $0x50] sm:$0xff]  ;;  %v224_v39 = vld [vmem:[%s518_s2] sm:$0xff] }
  0x12   :  { %249 = vmatpush.msra.mxu3 %v227_v21  ;;  %148 = vmatpush.msra.mxu1 %v74_v23  ;;  %v72_v38 = vld [vmem:[#allocation2 + $0x8] sm:$0xff]  ;;  %v71_v43 = vld [vmem:[#allocation2] sm:$0xff]  ;;  %v39_v44 = vld [vmem:[%s516_s0 + $0x10] sm:$0x3] }
  0x13   :  { %111 = vmatpush.msra.mxu0 %v84_v22  ;;  %196 = vmatpush.msra.mxu2 %v168_v24  ;;  %v63_v40 = vsel %vm60_vm0, %v61_v30, %v62_v34  ;;  %v52_v41 = vsel %vm49_vm1, %v50_v31, %v51_v35  ;;  %v81_v42 = vld [vmem:[#allocation2 + $0x48] sm:$0xff]  ;;  %v64_v45 = vrot.slane %v39_v44, 2  ;;  %v53_v46 = vrot.slane %v39_v44, 1  ;;  %v40_v49 = vld [vmem:[%s516_s0 + $0x18] sm:$0xff]  ;;  %v41_v50 = vld [vmem:[%s516_s0 + $0x20] sm:$0xff] }
  0x14   :  { %250 = vmatpush.msra.mxu3 %v226_v25  ;;  %149 = vmatpush.msra.mxu1 %v73_v28  ;;  %v66_v51 = vrot.slane %v40_v49, 2  ;;  %v67_v52 = vrot.slane %v41_v50, 2  ;;  %v55_v53 = vrot.slane %v40_v49, 1  ;;  %v56_v54 = vrot.slane %v41_v50, 1  ;;  %v42_v57 = vld [vmem:[%s516_s0 + $0x28] sm:$0x3] }
  0x15   :  { %112 = vmatpush.msra.mxu0 %v83_v27  ;;  %197 = vmatpush.msra.mxu2 %v167_v32  ;;  %v65_v47 = vsel %vm60_vm0, %v62_v34, %v64_v45  ;;  %v54_v48 = vsel %vm49_vm1, %v51_v35, %v53_v46  ;;  %v69_v58 = vrot.slane %v42_v57, 2  ;;  %v58_v59 = vrot.slane %v42_v57, 1  ;;  %v342_v1 = vld [vmem:[%s520_s4] ss:$0 sm:$0xff] }
  0x16   :  { %251 = vmatpush.msra.mxu3 %v225_v33  ;;  %150 = vmatpush.msra.mxu1 %v72_v38  ;;  %v68_v55 = vsel %vm60_vm0, %v66_v51, %v67_v52  ;;  %v57_v56 = vsel %vm49_vm1, %v55_v53, %v56_v54  ;;  %v341_v2 = vld [vmem:[%s519_s3] ss:$0 sm:$0xff]  ;;  %s398_s3 = smov [#allocation5]  }
  0x17   :  { %113 = vmatpush.msra.mxu0 %v82_v37  ;;  %198 = vmatpush.msra.mxu2 %v166_v36  ;;  %v70_v60 = vsel %vm60_vm0, %v67_v52, %v69_v58  ;;  %v59_v61 = vsel %vm49_vm1, %v56_v54, %v58_v59  ;;  %s306_s4 = sshll.u32 %s398_s3, 4  ;;  %s307_s4 = int_to_ptr.vmem [resolvable:$true] %s306_s4 }
  0x18   :  { %252 = vmatpush.msra.mxu3 %v224_v39  ;;  %329 = vmatmul.msk.f32.vlgmr.msra.gmra.mxu2 %vm90_vm2, %v63_v40 }
  0x19   :  { %333 = vmatmul.msk.f32.vlgmr.msra.gmra.mxu3 %vm90_vm2, %v52_v41  ;;  %114 = vmatpush.msra.mxu0 %v81_v42 }
  0x1a   :  { %151 = vmatpush.msra.mxu1 %v71_v43  ;;  %321 = vmatmul.msk.f32.vlgmr.msra.gmra.mxu0 %vm90_vm2, %v52_v41 }
  0x1b   :  { %325 = vmatmul.msk.f32.vlgmr.msra.gmra.mxu1 %vm90_vm2, %v37_v26 }
  0x20   :  { %330 = vmatmul.msk.f32.gmra.mxu2 %vm90_vm2, %v65_v47 }
  0x21   :  { %334 = vmatmul.msk.f32.gmra.mxu3 %vm90_vm2, %v54_v48 }
  0x22   :  { %322 = vmatmul.msk.f32.gmra.mxu0 %vm90_vm2, %v54_v48 }
  0x23   :  { %326 = vmatmul.msk.f32.gmra.mxu1 %vm90_vm2, %v38_v29 }
  0x28   :  { %331 = vmatmul.msk.f32.gmra.mxu2 %vm90_vm2, %v68_v55 }
  0x29   :  { %335 = vmatmul.msk.f32.gmra.mxu3 %vm90_vm2, %v57_v56 }
  0x2a   :  { %323 = vmatmul.msk.f32.gmra.mxu0 %vm90_vm2, %v57_v56 }
  0x2b   :  { %327 = vmatmul.msk.f32.gmra.mxu1 %vm90_vm2, %v40_v49 }
  0x30   :  { %332 = vmatmul.msk.f32.gmra.mxu2 %vm90_vm2, %v70_v60 }
  0x31   :  { %336 = vmatmul.msk.f32.gmra.mxu3 %vm90_vm2, %v59_v61 }
  0x32   :  { %324 = vmatmul.msk.f32.gmra.mxu0 %vm90_vm2, %v59_v61 }
  0x33   :  { %328 = vmatmul.msk.f32.gmra.mxu1 %vm90_vm2, %v41_v50 }
  0x97   :  { %v116_v62 = vpop.f32.mrf.mxu0 }
  0x98   :  { %v153_v63 = vpop.f32.mrf.mxu1 }
  0x99   :  { %v154_v0 = vadd.f32 %v153_v63, %v116_v62 }
  0x9b   :  { %v200_v3 = vpop.f32.mrf.mxu2 }
  0x9c   :  { %v254_v4 = vpop.f32.mrf.mxu3  ;;  %v212_v5 = vadd.f32 %v200_v3, %v154_v0 }
  0x9d   :  { %v255_v6 = vadd.f32 %v342_v1, %v254_v4 }
  0x9e   :  { %v220_v7 = vadd.f32 %v341_v2, %v212_v5 }
  0x9f   :  { %v282_v8 = vmul.f32 0.01, %v255_v6  ;;  %vm278_vm3 = vcmp.ge.f32.partialorder %v255_v6, 0.0  ;;  %v119_v9 = vpop.f32.mrf.mxu0 }
  0xa0   :  { %v156_v10 = vpop.f32.mrf.mxu1  ;;  %vm266_vm4 = vcmp.ge.f32.partialorder %v220_v7, 0.0  ;;  %v270_v11 = vmul.f32 0.01, %v220_v7 }
  0xa1   :  { %v157_v12 = vadd.f32 %v156_v10, %v119_v9  ;;  %v286_v14 = vsel %vm278_vm3, %v255_v6, %v282_v8 }
  0xa2   :  { %v274_v13 = vsel %vm266_vm4, %v220_v7, %v270_v11 }
  0xa3   :  { %v290_v15 = vmul.f32 %v286_v14, %v274_v13  ;;  %v203_v16 = vpop.f32.mrf.mxu2 }
  0xa4   :  { %v257_v17 = vpop.f32.mrf.mxu3  ;;  %v213_v18 = vadd.f32 %v203_v16, %v157_v12 }
  0xa5   :  { %v258_v19 = vadd.f32 %v342_v1, %v257_v17  ;;  %v294_v20 = vadd.f32 %v290_v15, %v286_v14 }
  0xa6   :  { %v221_v21 = vadd.f32 %v341_v2, %v213_v18 }
  0xa7   :  { %v283_v22 = vmul.f32 0.01, %v258_v19  ;;  %298 = vst [vmem:[#allocation5] sm:$0xff] %v294_v20  ;;  %vm279_vm5 = vcmp.ge.f32.partialorder %v258_v19, 0.0  ;;  %v122_v23 = vpop.f32.mrf.mxu0 }
  0xa8   :  { %v159_v24 = vpop.f32.mrf.mxu1  ;;  %vm267_vm6 = vcmp.ge.f32.partialorder %v221_v21, 0.0  ;;  %v271_v25 = vmul.f32 0.01, %v221_v21 }
  0xa9   :  { %v160_v26 = vadd.f32 %v159_v24, %v122_v23  ;;  %v287_v28 = vsel %vm279_vm5, %v258_v19, %v283_v22 }
  0xaa   :  { %v275_v27 = vsel %vm267_vm6, %v221_v21, %v271_v25 }
  0xab   :  { %v291_v29 = vmul.f32 %v287_v28, %v275_v27  ;;  %v206_v30 = vpop.f32.mrf.mxu2 }
  0xac   :  { %v260_v31 = vpop.f32.mrf.mxu3  ;;  %v214_v32 = vadd.f32 %v206_v30, %v160_v26 }
  0xad   :  { %v261_v33 = vadd.f32 %v342_v1, %v260_v31  ;;  %v295_v34 = vadd.f32 %v291_v29, %v287_v28 }
  0xae   :  { %v222_v35 = vadd.f32 %v341_v2, %v214_v32 }
  0xaf   :  { %v284_v36 = vmul.f32 0.01, %v261_v33  ;;  %299 = vst [vmem:[#allocation5 + $0x8] sm:$0xff] %v295_v34  ;;  %vm280_vm7 = vcmp.ge.f32.partialorder %v261_v33, 0.0  ;;  %v125_v37 = vpop.f32.mrf.mxu0 }
  0xb0   :  { %v162_v38 = vpop.f32.mrf.mxu1  ;;  %vm268_vm8 = vcmp.ge.f32.partialorder %v222_v35, 0.0  ;;  %v272_v39 = vmul.f32 0.01, %v222_v35 }
  0xb1   :  { %v163_v40 = vadd.f32 %v162_v38, %v125_v37  ;;  %v288_v42 = vsel %vm280_vm7, %v261_v33, %v284_v36 }
  0xb2   :  { %v276_v41 = vsel %vm268_vm8, %v222_v35, %v272_v39 }
  0xb3   :  { %v292_v43 = vmul.f32 %v288_v42, %v276_v41  ;;  %v209_v44 = vpop.f32.mrf.mxu2 }
  0xb4   :  { %v263_v45 = vpop.f32.mrf.mxu3  ;;  %v215_v46 = vadd.f32 %v209_v44, %v163_v40 }
  0xb5   :  { %v264_v47 = vadd.f32 %v342_v1, %v263_v45  ;;  %v296_v48 = vadd.f32 %v292_v43, %v288_v42 }
  0xb6   :  { %v223_v49 = vadd.f32 %v341_v2, %v215_v46 }
  0xb7   :  { %v285_v50 = vmul.f32 0.01, %v264_v47  ;;  %300 = vst [vmem:[#allocation5 + $0x10] sm:$0xff] %v296_v48  ;;  %vm281_vm9 = vcmp.ge.f32.partialorder %v264_v47, 0.0 }
  0xb8   :  { %vm269_vm10 = vcmp.ge.f32.partialorder %v223_v49, 0.0  ;;  %v273_v51 = vmul.f32 0.01, %v223_v49 }
  0xb9   :  { %v289_v53 = vsel %vm281_vm9, %v264_v47, %v285_v50 }
  0xba   :  { %v277_v52 = vsel %vm269_vm10, %v223_v49, %v273_v51 }
  0xbb   :  { %v293_v54 = vmul.f32 %v289_v53, %v277_v52 }
  0xbd   :  { %v297_v55 = vadd.f32 %v293_v54, %v289_v53 }
  0xbf   :  { %301 = vst [vmem:[#allocation5 + $0x18] sm:$0xff] %v297_v55 }
  0xc0   :  { %314 = dma.vmem_to_hbm [thread:$0]  %s307_s4, 512, %s309_s9, [#allocation4], %s396_s23, %s396_s23, %s397_s24  }
  0xc1   :  { %393 = dma.done.wait [#allocation4], 512  }
  0xc2   :  { %394 = vsyncadd [#allocation4], 4294966784 }
  0xc3   :  { %319 = vsyncpa [#allocation3], 1 }
  0xc4   :  { %320 = vsyncpa [#allocation4], 1 }

</bundles_post_ra>
